<compile_context>
chip_gen: v7x
topology: tpu7x:2x2x1
jax: 0.10.0
libtpu: 0.0.40
codegen_flags: <defaults>
</compile_context>

<pallas_src>
import functools
import math

import jax
import jax.numpy as jnp
from jax.experimental import pallas as pl
from jax.experimental.pallas import tpu as pltpu

_LANE = 128
_MAX_BLOCK_ROWS = 1024  # 1024x128 f32 block = 512 KiB/input; x2 inputs x2 buffers = 2 MiB VMEM


def _huber_partial_sum_kernel(p_ref, t_ref, o_ref, *, block_rows: int, delta: float,
                              n_valid: int, num_channels: int,
                              steps_per_split: int, steps_total: int):
    c = pl.program_id(0)   # split axis ("parallel": one per TensorCore on v7x)
    i = pl.program_id(1)   # streaming reduction axis ("arbitrary")

    @pl.when(i == 0)
    def _init():
        o_ref[...] = jnp.zeros_like(o_ref)

    # Flat element index of every entry of this (block_rows, 128) tile in the
    # original row-major buffer.  blk is clamped exactly like the index_map;
    # clamped-duplicate tiles are masked out entirely so nothing double-counts.
    blk = c * steps_per_split + i
    blk_clamped = jnp.minimum(blk, steps_total - 1)
    base = blk_clamped * (block_rows * _LANE)
    row = jax.lax.broadcasted_iota(jnp.int32, (block_rows, _LANE), 0)
    lane = jax.lax.broadcasted_iota(jnp.int32, (block_rows, _LANE), 1)
    flat = base + row * _LANE + lane

    valid = flat < n_valid                       # padded / ragged tail
    if num_channels > 3:                         # drop alpha & extra channels
        if (num_channels & (num_channels - 1)) == 0:
            ch = flat & (num_channels - 1)       # power-of-two channel count
        else:
            ch = flat % num_channels
        valid = valid & (ch < 3)
    valid = valid & (blk < steps_total)          # duplicated (clamped) tile

    d = p_ref[...].astype(jnp.float32) - t_ref[...].astype(jnp.float32)
    ad = jnp.abs(d)
    q = jnp.minimum(ad, delta)                   # branchless Huber
    h = 0.5 * q * q + delta * (ad - q)
    h = jnp.where(valid, h, 0.0)

    # Sublane-wise partial sums (pure VPU adds) into the resident (8,128) output
    # block; the tiny final reduction happens in JAX outside the kernel.
    o_ref[...] += h.reshape(block_rows // 8, 8, _LANE).sum(axis=0)


def image_loss(pred_image: jax.Array, target_image: jax.Array,
               weight: float = 1.0, delta: float = 0.1) -> jax.Array:
    """HuberLoss(delta)(pred[..., :3], target[..., :3]) * weight  (mean reduction)."""
    assert pred_image.shape == target_image.shape, "pred/target shape mismatch"
    shape = pred_image.shape
    num_channels = int(shape[-1])
    n_total = math.prod(shape)
    n_rgb = (n_total // num_channels) * min(3, num_channels)  # true element count of [..., :3]

    # Minimum sublane multiple for the native dtypes (f32 -> 8, bf16 -> 16, int8 -> 32).
    sub = max(8, 32 // jnp.dtype(pred_image.dtype).itemsize,
              32 // jnp.dtype(target_image.dtype).itemsize)
    slab = sub * _LANE

    p = pred_image.reshape(-1)
    t = target_image.reshape(-1)
    n_pad = pl.cdiv(n_total, slab) * slab
    if n_pad != n_total:  # usually a no-op: raw NHWC buffers are typically aligned
        p = jnp.pad(p, (0, n_pad - n_total))
        t = jnp.pad(t, (0, n_pad - n_total))
    rows = n_pad // _LANE
    p = p.reshape(rows, _LANE)
    t = t.reshape(rows, _LANE)

    block_rows = min(_MAX_BLOCK_ROWS, rows)       # multiple of `sub` by construction
    steps_total = pl.cdiv(rows, block_rows)
    num_split = 2 if steps_total >= 2 else 1      # v7x: one split per TensorCore
    steps_per_split = pl.cdiv(steps_total, num_split)

    kernel = functools.partial(
        _huber_partial_sum_kernel,
        block_rows=block_rows, delta=float(delta), n_valid=n_total,
        num_channels=num_channels, steps_per_split=steps_per_split,
        steps_total=steps_total)

    def in_map(c, i):
        return (jnp.minimum(c * steps_per_split + i, steps_total - 1), 0)

    partials = pl.pallas_call(
        kernel,
        out_shape=jax.ShapeDtypeStruct((num_split * 8, _LANE), jnp.float32),
        grid_spec=pltpu.PrefetchScalarGridSpec(
            num_scalar_prefetch=0,
            grid=(num_split, steps_per_split),
            in_specs=[pl.BlockSpec((block_rows, _LANE), in_map),
                      pl.BlockSpec((block_rows, _LANE), in_map)],
            out_specs=pl.BlockSpec((8, _LANE), lambda c, i: (c, 0)),
        ),
        compiler_params=pltpu.CompilerParams(
            dimension_semantics=("parallel", "arbitrary")),
    )(p, t)

    # mean over the true (unsliced-away, unpadded) RGB element count, times loss weight
    return jnp.sum(partials) * (float(weight) / float(n_rgb))


def _reference(pred_image, target_image, weight=1.0, delta=0.1):
    d = pred_image[..., :3].astype(jnp.float32) - target_image[..., :3].astype(jnp.float32)
    ad = jnp.abs(d)
    h = jnp.where(ad < delta, 0.5 * d * d, delta * (ad - 0.5 * delta))
    return jnp.mean(h) * weight


if __name__ == "__main__":
    key = jax.random.PRNGKey(0)
    k1, k2 = jax.random.split(key)
    # NHWC with 4 channels (RGBA-style) — the module only uses [..., :3]
    # TODO(synk): the "missing 'image' key -> warn and return 0" branch is Python-side
    # dict handling, not a kernel concern; the wrapper takes the arrays directly.
    pred = {"image": jax.random.uniform(k1, (2, 16, 16, 4), dtype=jnp.float32)}
    target = {"image": jax.random.uniform(k2, (2, 16, 16, 4), dtype=jnp.float32)}

    weight = 1.0
    loss = image_loss(pred["image"], target["image"], weight=weight)
    loss = jax.block_until_ready(loss)

    ref = _reference(pred["image"], target["image"], weight=weight)
    assert jnp.allclose(loss, ref, rtol=1e-5, atol=1e-6), (loss, ref)
    print("KERNEL_OK")
</pallas_src>

<mosaic_0001>
module attributes {stable_mosaic.version = 11 : i64} {
  func.func @_huber_partial_sum_kernel(%arg0: i32, %arg1: i32, %arg2: memref<16x128xf32, #tpu.memory_space<vmem>>, %arg3: memref<16x128xf32, #tpu.memory_space<vmem>>, %arg4: memref<8x128xf32, #tpu.memory_space<vmem>>) attributes {dimension_semantics = [#tpu.dimension_semantics<parallel>, #tpu.dimension_semantics<arbitrary>], iteration_bounds = array<i64: 1, 1>, scalar_prefetch = 0 : i64, scratch_operands = 0 : i64, tpu.core_type = #tpu.core_type<tc>, window_params = [{transform_indices = @transform_0, window_bounds = array<i64: 16, 128>}, {transform_indices = @transform_1, window_bounds = array<i64: 16, 128>}, {transform_indices = @transform_2, window_bounds = array<i64: 8, 128>}]} {
    %c0_i32 = arith.constant 0 : i32
    %0 = arith.cmpi eq, %arg1, %c0_i32 : i32
    %1 = arith.extui %0 : i1 to i32
    %c0_i32_0 = arith.constant 0 : i32
    %2 = arith.cmpi ne, %1, %c0_i32_0 : i32
    scf.if %2 {
      %cst_16 = arith.constant 0.000000e+00 : f32
      %44 = vector.broadcast %cst_16 : f32 to vector<8x128xf32>
      %c0_17 = arith.constant 0 : index
      %c0_18 = arith.constant 0 : index
      %45 = vector.load %arg4[%c0_17, %c0_18] : memref<8x128xf32, #tpu.memory_space<vmem>>, vector<8x128xf32>
      tpu.vector_store %arg4[%c0_17, %c0_18], %44 {strides = array<i32>} : memref<8x128xf32, #tpu.memory_space<vmem>>, vector<8x128xf32>,
    } else {
    }
    %c1_i32 = arith.constant 1 : i32
    %3 = arith.muli %arg0, %c1_i32 : i32
    %4 = arith.addi %3, %arg1 : i32
    %c0_i32_1 = arith.constant 0 : i32
    %5 = arith.minsi %4, %c0_i32_1 : i32
    %c2048_i32 = arith.constant 2048 : i32
    %6 = arith.muli %5, %c2048_i32 : i32
    %7 = tpu.iota {dimensions = array<i32: 0>} : vector<16x128xi32>
    %8 = tpu.iota {dimensions = array<i32: 1>} : vector<16x128xi32>
    %c128_i32 = arith.constant 128 : i32
    %9 = vector.broadcast %c128_i32 : i32 to vector<16x128xi32>
    %10 = arith.muli %7, %9 : vector<16x128xi32>
    %11 = vector.broadcast %6 : i32 to vector<16x128xi32>
    %12 = arith.addi %11, %10 : vector<16x128xi32>
    %13 = arith.addi %12, %8 : vector<16x128xi32>
    %c2048_i32_2 = arith.constant 2048 : i32
    %14 = vector.broadcast %c2048_i32_2 : i32 to vector<16x128xi32>
    %15 = arith.cmpi slt, %13, %14 : vector<16x128xi32>
    %c3_i32 = arith.constant 3 : i32
    %16 = vector.broadcast %c3_i32 : i32 to vector<16x128xi32>
    %17 = arith.andi %13, %16 : vector<16x128xi32>
    %c3_i32_3 = arith.constant 3 : i32
    %18 = vector.broadcast %c3_i32_3 : i32 to vector<16x128xi32>
    %19 = arith.cmpi slt, %17, %18 : vector<16x128xi32>
    %20 = arith.andi %15, %19 : vector<16x128xi1>
    %c1_i32_4 = arith.constant 1 : i32
    %21 = arith.cmpi slt, %4, %c1_i32_4 : i32
    %22 = vector.broadcast %21 : i1 to vector<16x128xi1>
    %23 = arith.andi %20, %22 : vector<16x128xi1>
    %c0 = arith.constant 0 : index
    %c0_5 = arith.constant 0 : index
    %24 = vector.load %arg2[%c0, %c0_5] : memref<16x128xf32, #tpu.memory_space<vmem>>, vector<16x128xf32>
    %c0_6 = arith.constant 0 : index
    %c0_7 = arith.constant 0 : index
    %25 = vector.load %arg3[%c0_6, %c0_7] : memref<16x128xf32, #tpu.memory_space<vmem>>, vector<16x128xf32>
    %26 = arith.subf %24, %25 : vector<16x128xf32>
    %27 = math.absf %26 : vector<16x128xf32>
    %cst = arith.constant 1.000000e-01 : f32
    %28 = vector.broadcast %cst : f32 to vector<16x128xf32>
    %29 = arith.minimumf %27, %28 : vector<16x128xf32>
    %cst_8 = arith.constant 5.000000e-01 : f32
    %30 = vector.broadcast %cst_8 : f32 to vector<16x128xf32>
    %31 = arith.mulf %30, %29 : vector<16x128xf32>
    %32 = arith.mulf %31, %29 : vector<16x128xf32>
    %33 = arith.subf %27, %29 : vector<16x128xf32>
    %cst_9 = arith.constant 1.000000e-01 : f32
    %34 = vector.broadcast %cst_9 : f32 to vector<16x128xf32>
    %35 = arith.mulf %34, %33 : vector<16x128xf32>
    %36 = arith.addf %32, %35 : vector<16x128xf32>
    %cst_10 = arith.constant 0.000000e+00 : f32
    %37 = vector.broadcast %cst_10 : f32 to vector<16x128xf32>
    %38 = arith.select %23, %36, %37 : vector<16x128xi1>, vector<16x128xf32>
    %c0_11 = arith.constant 0 : index
    %c0_12 = arith.constant 0 : index
    %39 = vector.load %arg4[%c0_11, %c0_12] : memref<8x128xf32, #tpu.memory_space<vmem>>, vector<8x128xf32>
    %40 = vector.shape_cast %38 : vector<16x128xf32> to vector<2x8x128xf32>
    %cst_13 = arith.constant dense<0.000000e+00> : vector<8x128xf32>
    %41 = vector.multi_reduction <add>, %40, %cst_13 [0] : vector<2x8x128xf32> to vector<8x128xf32>
    %42 = arith.addf %39, %41 : vector<8x128xf32>
    %c0_14 = arith.constant 0 : index
    %c0_15 = arith.constant 0 : index
    %43 = vector.load %arg4[%c0_14, %c0_15] : memref<8x128xf32, #tpu.memory_space<vmem>>, vector<8x128xf32>
    tpu.vector_store %arg4[%c0_14, %c0_15], %42 {strides = array<i32>} : memref<8x128xf32, #tpu.memory_space<vmem>>, vector<8x128xf32>,
    return
  }
  func.func @transform_0(%arg0: i32, %arg1: i32) -> (i32, i32) {
    %c1_i32 = arith.constant 1 : i32
    %0 = arith.muli %arg0, %c1_i32 : i32
    %1 = arith.addi %0, %arg1 : i32
    %c0_i32 = arith.constant 0 : i32
    %2 = arith.minsi %1, %c0_i32 : i32
    %c0_i32_0 = arith.constant 0 : i32
    %c0_i32_1 = arith.constant 0 : i32
    return %2, %c0_i32_0 : i32, i32
  }
  func.func @transform_1(%arg0: i32, %arg1: i32) -> (i32, i32) {
    %c1_i32 = arith.constant 1 : i32
    %0 = arith.muli %arg0, %c1_i32 : i32
    %1 = arith.addi %0, %arg1 : i32
    %c0_i32 = arith.constant 0 : i32
    %2 = arith.minsi %1, %c0_i32 : i32
    %c0_i32_0 = arith.constant 0 : i32
    %c0_i32_1 = arith.constant 0 : i32
    return %2, %c0_i32_0 : i32, i32
  }
  func.func @transform_2(%arg0: i32, %arg1: i32) -> (i32, i32) {
    %c0_i32 = arith.constant 0 : i32
    %c0_i32_0 = arith.constant 0 : i32
    return %arg0, %c0_i32 : i32, i32
  }
}

</mosaic_0001>

<bundles_post_ra>
// kernel: tpu_custom_call.1
= control target key start
LH: loop header
LB: loop body
LE: loop exit
PB: predicated region body
PF: predicated region fallthrough
CT: control target
= control target key end

     0   :  { %7 = vsyncpa [#allocation3], 0  ;;  %s275_s0 = inlined_call_operand.hbm [shape: f32[16,128], index: 0, kind: input, shape index: {}]   ;;  %s276_s1 = inlined_call_operand.hbm [shape: f32[16,128], index: 1, kind: input, shape index: {}]   ;;  %s277_s2 = inlined_call_operand.hbm [shape: f32[8,128], index: 2, kind: output, shape index: {}]  }
   0x1   :  { %8 = vsyncpa [#allocation6], 0 }
   0x2   :  { %9 = vsyncpa [#allocation4], 0  ;;  %s219_s9 = smov [#allocation2]   ;;  %s147_s13 = scalar_lea.hbm %s275_s0, 256 }
   0x3   :  { %s21_s10 = sshll.u32 %s219_s9, 4  ;;  %p148_p0 = scmp.ne.s32.totalorder %s275_s0, %s147_s13  ;;  %s22_s10 = int_to_ptr.vmem [resolvable:$true] %s21_s10 }
   0x4   :  { %p151_p1 = scmp.lt.u32.totalorder %s147_s13, %s275_s0 }
   0x6   :  { %p153_p2 = pnand %p151_p1, %p148_p0 }
   0x8   :  { %156 = shalt.err (!%p153_p2)
}
   0x9   :  { %s157_s18 = scalar_lea.vmem %s22_s10, 256  ;;  %p162_p4 = scmp.lt.s32.totalorder %s22_s10, %s22_s10 }
   0xa   :  { %p158_p3 = scmp.ne.s32.totalorder %s22_s10, %s157_s18  ;;  %p163_p5 = scmp.lt.s32.totalorder %s157_s18, %s157_s18 }
   0xc   :  { %p164_p6 = por %p163_p5, %p162_p4 }
   0xe   :  { %p165_p7 = pnand %p164_p6, %p158_p3 }
  0x10   :  { %168 = shalt.err (!%p165_p7)
}
  0x11   :  { %s220_s19 = smov 128   ;;  %s221_s20 = smov 8  }
  0x12   :  { %27 = dma.hbm_to_vmem [thread:$0]  %s275_s0, 256, %s22_s10, [#allocation3], %s220_s19, %s220_s19, %s221_s20  }
  0x13   :  { %s222_s23 = smov [#allocation5]   ;;  %s169_s27 = scalar_lea.hbm %s276_s1, 256 }
  0x14   :  { %s39_s24 = sshll.u32 %s222_s23, 4  ;;  %p170_p8 = scmp.ne.s32.totalorder %s276_s1, %s169_s27  ;;  %s40_s24 = int_to_ptr.vmem [resolvable:$true] %s39_s24 }
  0x15   :  { %p173_p9 = scmp.lt.u32.totalorder %s169_s27, %s276_s1 }
  0x17   :  { %p175_p10 = pnand %p173_p9, %p170_p8 }
  0x19   :  { %178 = shalt.err (!%p175_p10)
}
  0x1a   :  { %s179_s4 = scalar_lea.vmem %s40_s24, 256  ;;  %p184_p12 = scmp.lt.s32.totalorder %s40_s24, %s40_s24 }
  0x1b   :  { %p180_p11 = scmp.ne.s32.totalorder %s40_s24, %s179_s4  ;;  %p185_p13 = scmp.lt.s32.totalorder %s179_s4, %s179_s4 }
  0x1d   :  { %p186_p0 = por %p185_p13, %p184_p12 }
  0x1f   :  { %p187_p1 = pnand %p186_p0, %p180_p11 }
  0x21   :  { %190 = shalt.err (!%p187_p1)
}
  0x22   :  { %45 = dma.hbm_to_vmem [thread:$0]  %s276_s1, 256, %s40_s24, [#allocation6], %s220_s19, %s220_s19, %s221_s20  }
  0x23   :  { %213 = dma.done.wait [#allocation3], 256  }
  0x24   :  { %214 = vsyncadd [#allocation3], 4294967040 }
  0x25   :  { %215 = dma.done.wait [#allocation6], 256  }
  0x26   :  { %216 = vsyncadd [#allocation6], 4294967040  ;;  %v69_v0 = vlaneseq  ;;  %v95_v7 = vld [vmem:[#allocation2] sm:$0xff]  ;;  %v96_v8 = vld [vmem:[#allocation2 + $0x8] sm:$0xff]  ;;  %s223_s1 = smov [#allocation7]  }
  0x27   :  { %v97_v9 = vld [vmem:[#allocation5] sm:$0xff]  ;;  %v98_v11 = vld [vmem:[#allocation5 + $0x8] sm:$0xff]  ;;  %s127_s6 = sshll.u32 %s223_s1, 4  ;;  %s128_s6 = int_to_ptr.vmem [resolvable:$true] %s127_s6 }
  0x28   :  { %v70_v1 = vshrl.u32 %v69_v0, 7  ;;  %v73_v2 = vand.u32 127, %v69_v0  ;;  %v99_v12 = vsub.f32 %v95_v7, %v97_v9  ;;  %v100_v13 = vsub.f32 %v96_v8, %v98_v11  ;;  %s191_s7 = scalar_lea.vmem %s128_s6, 128  ;;  %p196_p3 = scmp.lt.s32.totalorder %s128_s6, %s128_s6 }
  0x29   :  { %p192_p2 = scmp.ne.s32.totalorder %s128_s6, %s191_s7  ;;  %p197_p4 = scmp.lt.s32.totalorder %s191_s7, %s191_s7 }
  0x2a   :  { %v71_v3 = vadd.s32 8, %v70_v1  ;;  %v74_v4 = vmul.u32 128, %v70_v1  ;;  %v101_v15 = vand.u32 2147483647, %v99_v12  ;;  %v102_v17 = vand.u32 2147483647, %v100_v13 }
  0x2b   :  { %p198_p5 = por %p197_p4, %p196_p3 }
  0x2c   :  { %v75_v5 = vmul.u32 128, %v71_v3  ;;  %v79_v6 = vadd.s32 %v74_v4, %v73_v2  ;;  %v103_v18 = vmin.f32 %v101_v15, 0.1  ;;  %v104_v19 = vmin.f32 %v102_v17, 0.1 }
  0x2d   :  { %p199_p6 = pnand %p198_p5, %p192_p2 }
  0x2e   :  { %v80_v10 = vadd.s32 %v75_v5, %v73_v2  ;;  %v83_v14 = vand.u32 3, %v79_v6  ;;  %vm81_vm0 = vcmp.lt.s32.totalorder %v79_v6, 2048  ;;  %v105_v20 = vmul.f32 0.5, %v103_v18 }
  0x2f   :  { %v109_v21 = vsub.f32 %v101_v15, %v103_v18  ;;  %v106_v22 = vmul.f32 0.5, %v104_v19  ;;  %v110_v23 = vsub.f32 %v102_v17, %v104_v19 }
  0x30   :  { %v84_v16 = vand.u32 3, %v80_v10  ;;  %vm85_vm1 = vcmp.lt.s32.totalorder %v83_v14, 3  ;;  %vm82_vm2 = vcmp.lt.s32.totalorder %v80_v10, 2048  ;;  %v107_v24 = vmul.f32 %v105_v20, %v103_v18 }
  0x31   :  { %v111_v25 = vmul.f32 0.1, %v109_v21  ;;  %vm87_vm4 = vmand %vm81_vm0, %vm85_vm1  ;;  %v108_v26 = vmul.f32 %v106_v22, %v104_v19  ;;  %v112_v27 = vmul.f32 0.1, %v110_v23 }
  0x32   :  { %vm86_vm3 = vcmp.lt.s32.totalorder %v84_v16, 3 }
  0x33   :  { %vm88_vm5 = vmand %vm82_vm2, %vm86_vm3  ;;  %v113_v28 = vadd.f32 %v111_v25, %v107_v24  ;;  %v114_v29 = vadd.f32 %v112_v27, %v108_v26 }
  0x35   :  { %v115_v30 = vsel %vm87_vm4, %v113_v28, 0.0  ;;  %v116_v31 = vsel %vm88_vm5, %v114_v29, 0.0 }
  0x36   :  { %v118_v32 = vadd.f32 %v116_v31, %v115_v30 }
  0x38   :  { %120 = vst [vmem:[#allocation7] sm:$0xff] %v118_v32 }
  0x39   :  { %202 = shalt.err (!%p199_p6)
}
  0x3a   :  { %s203_s10 = scalar_lea.hbm %s277_s2, 128 }
  0x3b   :  { %p204_p7 = scmp.ne.s32.totalorder %s277_s2, %s203_s10  ;;  %p207_p8 = scmp.lt.u32.totalorder %s203_s10, %s277_s2 }
  0x3d   :  { %p209_p9 = pnand %p207_p8, %p204_p7 }
  0x3f   :  { %212 = shalt.err (!%p209_p9)
}
  0x40   :  { %130 = dma.vmem_to_hbm [thread:$0]  %s128_s6, 128, %s277_s2, [#allocation4]  }
  0x41   :  { %217 = dma.done.wait [#allocation4], 128  }
  0x42   :  { %218 = vsyncadd [#allocation4], 4294967168 }
  0x43   :  { %134 = vsyncpa [#allocation3], 1 }
  0x44   :  { %135 = vsyncpa [#allocation6], 1 }
  0x45   :  { %136 = vsyncpa [#allocation4], 1 }

</bundles_post_ra>
